<compile_context>
chip_gen: v5e
topology: v5e:2x2
jax: 0.10.0
libtpu: 0.0.40
codegen_flags: <defaults>
</compile_context>

<pallas_src>
import functools

import jax
import jax.numpy as jnp
from jax.experimental import pallas as pl
from jax.experimental.pallas import tpu as pltpu

_EPS = 1e-5
_INV_SQRT2 = 0.7071067811865476


def _round_up(v, m):
    return ((v + m - 1) // m) * m


def _ffn_kernel(num_layers, *refs):
    # refs = (x, gamma, beta, w0, b0, w1, b1, ..., out)
    x_ref, gamma_ref, beta_ref = refs[0], refs[1], refs[2]
    wb_refs = refs[3:3 + 2 * num_layers]
    o_ref = refs[3 + 2 * num_layers]

    x = x_ref[...].astype(jnp.float32)            # (tm, D)
    gamma = gamma_ref[...].astype(jnp.float32)    # (1, D)
    beta = beta_ref[...].astype(jnp.float32)      # (1, D)

    def layernorm(v):
        mu = jnp.mean(v, axis=-1, keepdims=True)
        var = jnp.mean((v - mu) ** 2, axis=-1, keepdims=True)
        return (v - mu) * jax.lax.rsqrt(var + _EPS) * gamma + beta

    h = layernorm(x)
    for li in range(num_layers):
        w = wb_refs[2 * li][...]                           # (in, out), native dtype
        b = wb_refs[2 * li + 1][...].astype(jnp.float32)   # (1, out)
        # Matmul inputs in the weight dtype (bf16 MXU path if weights are
        # bf16), f32 accumulation.
        h = jnp.dot(h.astype(w.dtype), w,
                    preferred_element_type=jnp.float32) + b
        if li < num_layers - 1:
            # exact (erf-based) GELU, matching torch.nn.GELU() default
            h = 0.5 * h * (1.0 + jax.lax.erf(h * _INV_SQRT2))
        # dropout -> identity (eval mode)

    y = layernorm(h + x)
    o_ref[...] = y.astype(o_ref.dtype)


def feed_forward(x, gamma, beta, weights, biases, *, tm=512):
    """x: (B, S, D). weights[i]: (in_i, out_i) = torch weight.T. Returns (B, S, D)."""
    B, S, D = x.shape
    M = B * S
    num_layers = len(weights)

    # Row tile: as large as requested (multiple of 8), but keep at least 2
    # grid steps so the parallel row axis can be split across v7x's 2 cores.
    tm = max(8, min(_round_up(tm, 8), _round_up(pl.cdiv(M, 2), 8)))
    M_pad = _round_up(M, tm)

    x2 = x.reshape(M, D)
    if M_pad != M:
        x2 = jnp.pad(x2, ((0, M_pad - M), (0, 0)))

    gamma2 = gamma.reshape(1, D)
    beta2 = beta.reshape(1, D)
    biases2 = [b.reshape(1, -1) for b in biases]

    # Row-tile the activations; params use full-array blocks with a constant
    # index map (loaded once, resident across the row grid).
    in_specs = [
        pl.BlockSpec((tm, D), lambda i: (i, 0)),          # x rows (pipelined)
        pl.BlockSpec((1, D), lambda i: (0, 0)),           # gamma
        pl.BlockSpec((1, D), lambda i: (0, 0)),           # beta
    ]
    args = [x2, gamma2, beta2]
    for w, b in zip(weights, biases2):
        in_specs.append(pl.BlockSpec(w.shape, lambda i: (0, 0)))
        in_specs.append(pl.BlockSpec(b.shape, lambda i: (0, 0)))
        args.append(w)
        args.append(b)

    # VMEM budget: double-buffered activation tiles + (double-buffered) params
    # + f32 temporaries inside the body, with headroom; capped at v7x's 64 MiB.
    widest = max([D] + [int(w.shape[1]) for w in weights])
    itemsize = jnp.dtype(x.dtype).itemsize
    param_bytes = sum(int(w.size) * w.dtype.itemsize for w in weights)
    param_bytes += sum(int(b.size) * b.dtype.itemsize for b in biases)
    param_bytes += 2 * D * 4
    act_bytes = 2 * 2 * tm * D * itemsize            # in + out, double-buffered
    tmp_bytes = 4 * tm * widest * 4                  # f32 temporaries in body
    vmem_needed = act_bytes + 2 * param_bytes + tmp_bytes + (4 << 20)
    vmem_limit = int(min(64 << 20, max(16 << 20, vmem_needed)))

    out = pl.pallas_call(
        functools.partial(_ffn_kernel, num_layers),
        out_shape=jax.ShapeDtypeStruct((M_pad, D), x.dtype),
        grid_spec=pltpu.PrefetchScalarGridSpec(
            num_scalar_prefetch=0,
            grid=(M_pad // tm,),
            in_specs=in_specs,
            out_specs=pl.BlockSpec((tm, D), lambda i: (i, 0)),
        ),
        compiler_params=pltpu.CompilerParams(
            dimension_semantics=("parallel",),
            vmem_limit_bytes=vmem_limit),
    )(*args)
    return out[:M].reshape(B, S, D)


def _reference(x, gamma, beta, weights, biases):
    def ln(v):
        mu = jnp.mean(v, axis=-1, keepdims=True)
        var = jnp.mean((v - mu) ** 2, axis=-1, keepdims=True)
        return (v - mu) / jnp.sqrt(var + _EPS) * gamma + beta

    h = ln(x)
    for i, (w, b) in enumerate(zip(weights, biases)):
        h = h @ w + b
        if i < len(weights) - 1:
            h = jax.nn.gelu(h, approximate=False)
    return ln(h + x)


if __name__ == "__main__":
    key = jax.random.PRNGKey(0)
    keys = jax.random.split(key, 16)

    # x: (batch, N+1, D) with one hidden layer, like FeedForward(D, [2*D])
    B, S, D = 2, 8, 32
    hidden_dims = [64]

    x = jax.random.normal(keys[0], (B, S, D), dtype=jnp.float32)

    # Shared LayerNorm params (non-trivial, to exercise the affine path).
    gamma = 1.0 + 0.1 * jax.random.normal(keys[10], (D,), dtype=jnp.float32)
    beta = 0.1 * jax.random.normal(keys[11], (D,), dtype=jnp.float32)

    # Linear weights, torch-style uniform(-1/sqrt(in), 1/sqrt(in)),
    # stored as (in, out) so the kernel computes h @ W + b.
    dims = [D] + hidden_dims + [D]
    weights, biases = [], []
    for li in range(len(dims) - 1):
        fan_in, fan_out = dims[li], dims[li + 1]
        bound = 1.0 / (fan_in ** 0.5)
        w = jax.random.uniform(keys[2 * li + 1], (fan_in, fan_out),
                               minval=-bound, maxval=bound, dtype=jnp.float32)
        b = jax.random.uniform(keys[2 * li + 2], (fan_out,),
                               minval=-bound, maxval=bound, dtype=jnp.float32)
        weights.append(w)
        biases.append(b)

    # Case 1: standard shape.
    y = jax.block_until_ready(feed_forward(x, gamma, beta, weights, biases))
    y_ref = _reference(x, gamma, beta, weights, biases)
    assert jnp.allclose(y, y_ref, atol=1e-4, rtol=1e-4), (
        float(jnp.max(jnp.abs(y - y_ref))))

    # Case 2: row count not a multiple of the tile -> exercises row padding.
    B2, S2 = 3, 5
    x_odd = jax.random.normal(keys[9], (B2, S2, D), dtype=jnp.float32)
    y2 = jax.block_until_ready(feed_forward(x_odd, gamma, beta, weights, biases))
    y2_ref = _reference(x_odd, gamma, beta, weights, biases)
    assert jnp.allclose(y2, y2_ref, atol=1e-4, rtol=1e-4), (
        float(jnp.max(jnp.abs(y2 - y2_ref))))

    print("KERNEL_OK")
</pallas_src>

<mosaic_0001>
module attributes {stable_mosaic.version = 11 : i64} {
  func.func @_ffn_kernel(%arg0: i32, %arg1: memref<8x32xf32, #tpu.memory_space<vmem>>, %arg2: memref<1x32xf32, #tpu.memory_space<vmem>>, %arg3: memref<1x32xf32, #tpu.memory_space<vmem>>, %arg4: memref<32x64xf32, #tpu.memory_space<vmem>>, %arg5: memref<1x64xf32, #tpu.memory_space<vmem>>, %arg6: memref<64x32xf32, #tpu.memory_space<vmem>>, %arg7: memref<1x32xf32, #tpu.memory_space<vmem>>, %arg8: memref<8x32xf32, #tpu.memory_space<vmem>>) attributes {dimension_semantics = [#tpu.dimension_semantics<parallel>], iteration_bounds = array<i64: 2>, scalar_prefetch = 0 : i64, scratch_operands = 0 : i64, tpu.core_type = #tpu.core_type<tc>, window_params = [{transform_indices = @transform_0, window_bounds = array<i64: 8, 32>}, {pipeline_mode = #tpu.pipeline_mode<synchronous>, transform_indices = @transform_1, window_bounds = array<i64: 1, 32>}, {pipeline_mode = #tpu.pipeline_mode<synchronous>, transform_indices = @transform_2, window_bounds = array<i64: 1, 32>}, {pipeline_mode = #tpu.pipeline_mode<synchronous>, transform_indices = @transform_3, window_bounds = array<i64: 32, 64>}, {pipeline_mode = #tpu.pipeline_mode<synchronous>, transform_indices = @transform_4, window_bounds = array<i64: 1, 64>}, {pipeline_mode = #tpu.pipeline_mode<synchronous>, transform_indices = @transform_5, window_bounds = array<i64: 64, 32>}, {pipeline_mode = #tpu.pipeline_mode<synchronous>, transform_indices = @transform_6, window_bounds = array<i64: 1, 32>}, {transform_indices = @transform_7, window_bounds = array<i64: 8, 32>}]} {
    %c0 = arith.constant 0 : index
    %c0_0 = arith.constant 0 : index
    %0 = vector.load %arg1[%c0, %c0_0] : memref<8x32xf32, #tpu.memory_space<vmem>>, vector<8x32xf32>
    %c0_1 = arith.constant 0 : index
    %c0_2 = arith.constant 0 : index
    %1 = vector.load %arg2[%c0_1, %c0_2] : memref<1x32xf32, #tpu.memory_space<vmem>>, vector<1x32xf32>
    %c0_3 = arith.constant 0 : index
    %c0_4 = arith.constant 0 : index
    %2 = vector.load %arg3[%c0_3, %c0_4] : memref<1x32xf32, #tpu.memory_space<vmem>>, vector<1x32xf32>
    %cst = arith.constant dense<0.000000e+00> : vector<8xf32>
    %3 = vector.multi_reduction <add>, %0, %cst [1] : vector<8x32xf32> to vector<8xf32>
    %4 = vector.shape_cast %3 : vector<8xf32> to vector<8x1xf32>
    %cst_5 = arith.constant 3.200000e+01 : f32
    %5 = vector.broadcast %cst_5 : f32 to vector<8x1xf32>
    %6 = arith.divf %4, %5 : vector<8x1xf32>
    %7 = vector.broadcast %6 : vector<8x1xf32> to vector<8x32xf32>
    %8 = arith.subf %0, %7 : vector<8x32xf32>
    %9 = arith.mulf %8, %8 : vector<8x32xf32>
    %cst_6 = arith.constant dense<0.000000e+00> : vector<8xf32>
    %10 = vector.multi_reduction <add>, %9, %cst_6 [1] : vector<8x32xf32> to vector<8xf32>
    %11 = vector.shape_cast %10 : vector<8xf32> to vector<8x1xf32>
    %cst_7 = arith.constant 3.200000e+01 : f32
    %12 = vector.broadcast %cst_7 : f32 to vector<8x1xf32>
    %13 = arith.divf %11, %12 : vector<8x1xf32>
    %14 = vector.broadcast %6 : vector<8x1xf32> to vector<8x32xf32>
    %15 = arith.subf %0, %14 : vector<8x32xf32>
    %cst_8 = arith.constant 9.99999974E-6 : f32
    %16 = vector.broadcast %cst_8 : f32 to vector<8x1xf32>
    %17 = arith.addf %13, %16 : vector<8x1xf32>
    %18 = math.rsqrt %17 : vector<8x1xf32>
    %19 = vector.broadcast %18 : vector<8x1xf32> to vector<8x32xf32>
    %20 = arith.mulf %15, %19 : vector<8x32xf32>
    %21 = vector.broadcast %1 : vector<1x32xf32> to vector<8x32xf32>
    %22 = arith.mulf %20, %21 : vector<8x32xf32>
    %23 = vector.broadcast %2 : vector<1x32xf32> to vector<8x32xf32>
    %24 = arith.addf %22, %23 : vector<8x32xf32>
    %c0_9 = arith.constant 0 : index
    %c0_10 = arith.constant 0 : index
    %25 = vector.load %arg4[%c0_9, %c0_10] : memref<32x64xf32, #tpu.memory_space<vmem>>, vector<32x64xf32>
    %c0_11 = arith.constant 0 : index
    %c0_12 = arith.constant 0 : index
    %26 = vector.load %arg5[%c0_11, %c0_12] : memref<1x64xf32, #tpu.memory_space<vmem>>, vector<1x64xf32>
    %cst_13 = arith.constant dense<0.000000e+00> : vector<8x64xf32>
    %27 = tpu.matmul %24, %25, %cst_13 {dimension_numbers = #tpu.dot_dimension_numbers<[1], [0], [0], [1], [0, 0, 1, 1], [], []>} : vector<8x32xf32>, vector<32x64xf32>, vector<8x64xf32> -> vector<8x64xf32>
    %28 = vector.broadcast %26 : vector<1x64xf32> to vector<8x64xf32>
    %29 = arith.addf %27, %28 : vector<8x64xf32>
    %cst_14 = arith.constant 5.000000e-01 : f32
    %30 = vector.broadcast %cst_14 : f32 to vector<8x64xf32>
    %31 = arith.mulf %30, %29 : vector<8x64xf32>
    %cst_15 = arith.constant 0.707106769 : f32
    %32 = vector.broadcast %cst_15 : f32 to vector<8x64xf32>
    %33 = arith.mulf %29, %32 : vector<8x64xf32>
    %34 = math.erf %33 : vector<8x64xf32>
    %cst_16 = arith.constant 1.000000e+00 : f32
    %35 = vector.broadcast %cst_16 : f32 to vector<8x64xf32>
    %36 = arith.addf %35, %34 : vector<8x64xf32>
    %37 = arith.mulf %31, %36 : vector<8x64xf32>
    %c0_17 = arith.constant 0 : index
    %c0_18 = arith.constant 0 : index
    %38 = vector.load %arg6[%c0_17, %c0_18] : memref<64x32xf32, #tpu.memory_space<vmem>>, vector<64x32xf32>
    %c0_19 = arith.constant 0 : index
    %c0_20 = arith.constant 0 : index
    %39 = vector.load %arg7[%c0_19, %c0_20] : memref<1x32xf32, #tpu.memory_space<vmem>>, vector<1x32xf32>
    %cst_21 = arith.constant dense<0.000000e+00> : vector<8x32xf32>
    %40 = tpu.matmul %37, %38, %cst_21 {dimension_numbers = #tpu.dot_dimension_numbers<[1], [0], [0], [1], [0, 0, 1, 1], [], []>} : vector<8x64xf32>, vector<64x32xf32>, vector<8x32xf32> -> vector<8x32xf32>
    %41 = vector.broadcast %39 : vector<1x32xf32> to vector<8x32xf32>
    %42 = arith.addf %40, %41 : vector<8x32xf32>
    %43 = arith.addf %42, %0 : vector<8x32xf32>
    %cst_22 = arith.constant dense<0.000000e+00> : vector<8xf32>
    %44 = vector.multi_reduction <add>, %43, %cst_22 [1] : vector<8x32xf32> to vector<8xf32>
    %45 = vector.shape_cast %44 : vector<8xf32> to vector<8x1xf32>
    %cst_23 = arith.constant 3.200000e+01 : f32
    %46 = vector.broadcast %cst_23 : f32 to vector<8x1xf32>
    %47 = arith.divf %45, %46 : vector<8x1xf32>
    %48 = vector.broadcast %47 : vector<8x1xf32> to vector<8x32xf32>
    %49 = arith.subf %43, %48 : vector<8x32xf32>
    %50 = arith.mulf %49, %49 : vector<8x32xf32>
    %cst_24 = arith.constant dense<0.000000e+00> : vector<8xf32>
    %51 = vector.multi_reduction <add>, %50, %cst_24 [1] : vector<8x32xf32> to vector<8xf32>
    %52 = vector.shape_cast %51 : vector<8xf32> to vector<8x1xf32>
    %cst_25 = arith.constant 3.200000e+01 : f32
    %53 = vector.broadcast %cst_25 : f32 to vector<8x1xf32>
    %54 = arith.divf %52, %53 : vector<8x1xf32>
    %55 = vector.broadcast %47 : vector<8x1xf32> to vector<8x32xf32>
    %56 = arith.subf %43, %55 : vector<8x32xf32>
    %cst_26 = arith.constant 9.99999974E-6 : f32
    %57 = vector.broadcast %cst_26 : f32 to vector<8x1xf32>
    %58 = arith.addf %54, %57 : vector<8x1xf32>
    %59 = math.rsqrt %58 : vector<8x1xf32>
    %60 = vector.broadcast %59 : vector<8x1xf32> to vector<8x32xf32>
    %61 = arith.mulf %56, %60 : vector<8x32xf32>
    %62 = vector.broadcast %1 : vector<1x32xf32> to vector<8x32xf32>
    %63 = arith.mulf %61, %62 : vector<8x32xf32>
    %64 = vector.broadcast %2 : vector<1x32xf32> to vector<8x32xf32>
    %65 = arith.addf %63, %64 : vector<8x32xf32>
    %c0_27 = arith.constant 0 : index
    %c0_28 = arith.constant 0 : index
    %66 = vector.load %arg8[%c0_27, %c0_28] : memref<8x32xf32, #tpu.memory_space<vmem>>, vector<8x32xf32>
    tpu.vector_store %arg8[%c0_27, %c0_28], %65 {strides = array<i32>} : memref<8x32xf32, #tpu.memory_space<vmem>>, vector<8x32xf32>,
    return
  }
  func.func @transform_0(%arg0: i32) -> (i32, i32) {
    %c0_i32 = arith.constant 0 : i32
    %c0_i32_0 = arith.constant 0 : i32
    return %arg0, %c0_i32 : i32, i32
  }
  func.func @transform_1(%arg0: i32) -> (i32, i32) {
    %c0_i32 = arith.constant 0 : i32
    %c0_i32_0 = arith.constant 0 : i32
    %c0_i32_1 = arith.constant 0 : i32
    return %c0_i32, %c0_i32_0 : i32, i32
  }
  func.func @transform_2(%arg0: i32) -> (i32, i32) {
    %c0_i32 = arith.constant 0 : i32
    %c0_i32_0 = arith.constant 0 : i32
    %c0_i32_1 = arith.constant 0 : i32
    return %c0_i32, %c0_i32_0 : i32, i32
  }
  func.func @transform_3(%arg0: i32) -> (i32, i32) {
    %c0_i32 = arith.constant 0 : i32
    %c0_i32_0 = arith.constant 0 : i32
    %c0_i32_1 = arith.constant 0 : i32
    return %c0_i32, %c0_i32_0 : i32, i32
  }
  func.func @transform_4(%arg0: i32) -> (i32, i32) {
    %c0_i32 = arith.constant 0 : i32
    %c0_i32_0 = arith.constant 0 : i32
    %c0_i32_1 = arith.constant 0 : i32
    return %c0_i32, %c0_i32_0 : i32, i32
  }
  func.func @transform_5(%arg0: i32) -> (i32, i32) {
    %c0_i32 = arith.constant 0 : i32
    %c0_i32_0 = arith.constant 0 : i32
    %c0_i32_1 = arith.constant 0 : i32
    return %c0_i32, %c0_i32_0 : i32, i32
  }
  func.func @transform_6(%arg0: i32) -> (i32, i32) {
    %c0_i32 = arith.constant 0 : i32
    %c0_i32_0 = arith.constant 0 : i32
    %c0_i32_1 = arith.constant 0 : i32
    return %c0_i32, %c0_i32_0 : i32, i32
  }
  func.func @transform_7(%arg0: i32) -> (i32, i32) {
    %c0_i32 = arith.constant 0 : i32
    %c0_i32_0 = arith.constant 0 : i32
    return %arg0, %c0_i32 : i32, i32
  }
}

</mosaic_0001>

<bundles_post_ra>
// kernel: tpu_custom_call.1
= control target key start
LH: loop header
LB: loop body
LE: loop exit
PB: predicated region body
PF: predicated region fallthrough
CT: control target
= control target key end

     0   :  { %12 = vsyncpa [#allocation3], 0  ;;  %s855_s0 = inlined_call_operand.vmem [shape: f32[16,32], index: 0, kind: input, shape index: {}]   ;;  %s856_s1 = inlined_call_operand.vmem [shape: f32[1,32], index: 1, kind: input, shape index: {}]   ;;  %s857_s2 = inlined_call_operand.vmem [shape: f32[1,32], index: 2, kind: input, shape index: {}]   ;;  %s858_s3 = inlined_call_operand.vmem [shape: f32[32,64], index: 3, kind: input, shape index: {}]   ;;  %s859_s4 = inlined_call_operand.vmem [shape: f32[1,64], index: 4, kind: input, shape index: {}]   ;;  %s860_s5 = inlined_call_operand.vmem [shape: f32[64,32], index: 5, kind: input, shape index: {}]   ;;  %s861_s6 = inlined_call_operand.vmem [shape: f32[1,32], index: 6, kind: input, shape index: {}]   ;;  %s862_s7 = inlined_call_operand.hbm [shape: f32[16,32], index: 7, kind: output, shape index: {}]  }
   0x1   :  { %14 = vsyncpa [#allocation3 + $0x1], 0  ;;  %s697_s24 = smov 0   ;;  %s699_s25 = smov 0  }
   0x2   :  { %s701_s26 = smov 0   ;;  %s703_s27 = smov 0  }
   0x3 LB: > { %s718_s28 = sadd.s32 4294967295, %s654_s27   ;;  %s527_s29 = sadd.s32 4294967294, %s654_s27   ;;  %s654_s27 = sphi %s703_s27, %s868_s27   ;;  %s650_s26 = sphi %s701_s26, %s867_s26   ;;  %s646_s25 = sphi %s699_s25, %s866_s25   ;;  %s642_s24 = sphi %s697_s24, %s865_s24  }
   0x4   : > { %s722_s30 = sadd.s32 1, %s654_s27   ;;  %s179_s8 = sadd.s32 1, %s650_s26 }
   0x5   : > { %s176_s9 = ssub.s32 %s654_s27, %s722_s30  ;;  %p189_p0 = scmp.ne.s32.totalorder %s650_s26, %s646_s25 }
   0x6   : > { %p177_p1 = scmp.eq.s32.totalorder %s176_s9, 0  ;;  %p190_p2 = scmp.eq.s32.totalorder %s718_s28, 1 }
   0x7   : > { %p195_p3 = scmp.ne.s32.totalorder %s646_s25, %s642_s24  ;;  %p196_p4 = scmp.eq.s32.totalorder %s527_s29, 1 }
   0x8   : > { %s733_s10 = scalar_select %p177_p1, %s650_s26, %s179_s8  }
   0x9   : > { %p735_p5 = por %p190_p2, %p189_p0  ;;  %p739_p6 = por %p196_p4, %p195_p3 }
   0xa   : > { %p530_p7 = scmp.ge.s32.totalorder %s654_s27, 1  ;;  %p239_p8 = scmp.lt.s32.totalorder %s654_s27, 3 }
   0xc   : > { %p240_p9 = pnand %p530_p7, %p239_p8 }
   0xd   : > { %p270_p10 = scmp.lt.s32.totalorder (!%p240_p9), %s718_s28, 1  ;;  %s267_s22 = sand.u32 (!%p240_p9), 1, %s646_s25  }
   0xe   : > { %243 = sbr.rel (%p240_p9) target bundleno = 872 (0x368), region = 48  ;;  %s531_s23 = sshll.u32 (!%p240_p9), %s267_s22, 3 }
   0xf   : > { %s537_s29 = sshll.u32 (!%p240_p9), %s718_s28, 3  ;;  %s612_s21 = scalar_lea.hbm (!%p240_p9), %s862_s7, 16 }
  0x13   : > { %s271_s13 = scalar_select %p270_p10, %s718_s28, 1  ;;  %vm277_vm0 = vcmask 261120   ;;  %v656_v2 = vmov 32.0   ;;  %v318_v14 = vld [vmem:[%s858_s3 + $0x18] sm:$0xff]  ;;  %v317_v15 = vld [vmem:[%s858_s3 + $0x10] sm:$0xff]  ;;  %v316_v16 = vld [vmem:[%s858_s3 + $0x8] sm:$0xff] }
  0x14   : > { %584 = vrcp.f32 %v656_v2  ;;  %338 = vmatpush.msra.mxu0 %v318_v14  ;;  %v315_v17 = vld [vmem:[%s858_s3] sm:$0xff]  ;;  %v397_v39 = vld [vmem:[%s860_s5 + $0x38] sm:$0xff]  ;;  %v396_v42 = vld [vmem:[%s860_s5 + $0x30] sm:$0xff]  ;;  %vm402_vm9 = vcmask 523264   ;;  %s453_s28 = scalar_lea.sflag [#allocation3], %s267_s22 }
  0x15   : > { %s532_s14 = sshll.u32 %s271_s13, 3  ;;  %v775_v27 = vld [vmem:[%s856_s1] ss:$0 sm:$0xff]  ;;  %414 = vmatpush.msra.mxu1 %v397_v39  ;;  %v395_v45 = vld [vmem:[%s860_s5 + $0x28] sm:$0xff]  ;;  %v393_v49 = vld [vmem:[%s860_s5 + $0x18] sm:$0xff]  ;;  %s463_s13 = scalar_lea.hbm %s862_s7, %s537_s29 }
  0x16   : > { %s273_s17 = scalar_lea.vmem %s855_s0, %s532_s14  ;;  %339 = vmatpush.msra.mxu0 %v317_v15  ;;  %v780_v30 = vld [vmem:[%s857_s2] ss:$0 sm:$0xff]  ;;  %v392_v51 = vld [vmem:[%s860_s5 + $0x10] sm:$0xff]  ;;  %v391_v54 = vld [vmem:[%s860_s5 + $0x8] sm:$0xff]  ;;  %s269_s14 = scalar_lea.vmem [#allocation2], %s531_s23 }
  0x17   : > { %v750_v0 = vld [vmem:[%s273_s17] sm:$0xff]  ;;  %415 = vmatpush.msra.mxu1 %v396_v42  ;;  %s465_s15 = sshll.u32 %s269_s14, 4  ;;  %s467_s16 = sshll.u32 %s463_s13, 4  ;;  %s466_s15 = int_to_ptr.vmem [resolvable:$true] %s465_s15  ;;  %s468_s16 = int_to_ptr.hbm [resolvable:$true] %s467_s16 }
  0x18   : > { %v278_v1 = vsel %vm277_vm0, %v750_v0, 0.0  ;;  %340 = vmatpush.msra.mxu0 %v316_v16  ;;  %v582_v33 = vld [vmem:[%s859_s4] ss:$0 sm:$0xff]  ;;  %s606_s17 = sshra.s32 %s468_s16, 4  ;;  %s607_s17 = int_to_ptr.hbm [resolvable:$true] %s606_s17 }
  0x19   : > { %279 = vadd.xlane.f32.xlu0 %v278_v1  ;;  %416 = vmatpush.msra.mxu1 %v395_v45  ;;  %v394_v48 = vld [vmem:[%s860_s5 + $0x20] sm:$0xff]  ;;  %s608_s18 = scalar_lea.hbm %s607_s17, 8  ;;  %p613_p0 = scmp.lt.s32.totalorder %s607_s17, %s862_s7 }
  0x1a   : > { %v585_v3 = vpop.eup %584  ;;  %341 = vmatpush.msra.mxu0 %v315_v17  ;;  %v390_v56 = vld [vmem:[%s860_s5] sm:$0xff]  ;;  %p609_p11 = scmp.ne.s32.totalorder %s607_s17, %s608_s18  ;;  %p614_p1 = scmp.lt.s32.totalorder %s612_s21, %s608_s18 }
  0x1b   : > { %v282_v4 = vmul.f32 32.0, %v585_v3  ;;  %vm286_vm1 = vweird.f32 %v585_v3  ;;  %417 = vmatpush.msra.mxu1 %v394_v48 }
  0x1c   : > { %p610_p12 = pnand %p609_p11, %p735_p5  ;;  %p615_p2 = por %p614_p1, %p613_p0 }
  0x1d   : > { %v283_v5 = vsub.f32 1.0, %v282_v4  ;;  %418 = vmatpush.msra.mxu1 %v393_v49 }
  0x1e   : > { %p611_p13 = pneg %p610_p12 }
  0x1f   : > { %v284_v6 = vmul.f32 %v585_v3, %v283_v5  ;;  %419 = vmatpush.msra.mxu1 %v392_v51 }
  0x20   : > { %p616_p3 = pnand %p615_p2, %p611_p13 }
  0x21   : > { %v285_v7 = vadd.f32 %v585_v3, %v284_v6  ;;  %420 = vmatpush.msra.mxu1 %v391_v54 }
  0x23   : > { %v754_v8 = vsel %vm286_vm1, %v585_v3, %v285_v7  ;;  %421 = vmatpush.msra.mxu1 %v390_v56 }
  0x8c   : > { %v280_v9 = vpop.xlane.xlu0 %279 }
  0x8d   : > { %v288_v10 = vmul.f32 %v754_v8, %v280_v9 }
  0x8f   : > { %v289_v11 = vsub.f32 %v750_v0, %v288_v10 }
  0x91   : > { %v290_v12 = vmul.f32 %v289_v11, %v289_v11 }
  0x93   : > { %v291_v13 = vsel %vm277_vm0, %v290_v12, 0.0 }
  0x94   : > { %292 = vadd.xlane.f32.xlu0 %v291_v13 }
 0x107   : > { %v293_v18 = vpop.xlane.xlu0 %292 }
 0x108   : > { %v294_v19 = vmul.f32 %v293_v18, %v754_v8 }
 0x10a   : > { %v295_v20 = vadd.f32 1e-05, %v294_v19 }
 0x10c   : > { %586 = vrsqrt.f32 %v295_v20  ;;  %vm302_vm3 = vweird.f32 %v295_v20 }
 0x112   : > { %v587_v21 = vpop.eup %586 }
 0x113   : > { %v297_v22 = vmul.f32 %v587_v21, %v295_v20  ;;  %vm303_vm2 = vweird.f32 %v587_v21 }
 0x114   : > { %vm304_vm4 = vmor %vm302_vm3, %vm303_vm2 }
 0x115   : > { %v298_v23 = vmul.f32 %v587_v21, %v297_v22 }
 0x117   : > { %v299_v24 = vmul.f32 0.5, %v298_v23 }
 0x119   : > { %v300_v25 = vsub.f32 1.5, %v299_v24 }
 0x11b   : > { %v301_v26 = vmul.f32 %v587_v21, %v300_v25 }
 0x11d   : > { %v305_v28 = vsel %vm304_vm4, %v587_v21, %v301_v26  ;;  %v583_v21 = vld [vmem:[%s861_s6] ss:$0 sm:$0xff] }
 0x11e   : > { %v306_v29 = vmul.f32 %v305_v28, %v289_v11 }
 0x120   : > { %v310_v31 = vmul.f32 %v775_v27, %v306_v29 }
 0x122   : > { %v314_v32 = vadd.f32 %v780_v30, %v310_v31 }
 0x124   : > { %533 = vmatmul.msk.f32.vlgmr.msra.gmra.mxu0 %vm277_vm0, %v314_v32 }
 0x1a1   : > { %v343_v34 = vpop.f32.mrf.mxu0 }
 0x1a2   : > { %v344_v35 = vadd.f32 %v582_v33, %v343_v34 }
 0x1a4   : > { %v347_v36 = vmul.f32 0.70710677, %v344_v35  ;;  %v346_v18 = vmul.f32 0.5, %v344_v35 }
 0x1a6   : > { %v348_v37 = vmul.f32 %v347_v36, %v347_v36 }
 0x1a8   : > { %v349_v38 = vmin.f32 %v348_v37, 16.0 }
 0x1aa   : > { %v350_v40 = vmul.f32 2.1237322e-06, %v349_v38  ;;  %v361_v41 = vmul.f32 3.8918573e-05, %v349_v38 }
 0x1ac   : > { %v351_v43 = vadd.f32 0.00028619796, %v350_v40  ;;  %v362_v44 = vadd.f32 0.001143296, %v361_v41 }
 0x1ae   : > { %v352_v46 = vmul.f32 %v351_v43, %v349_v38  ;;  %v363_v47 = vmul.f32 %v362_v44, %v349_v38 }
 0x1b0   : > { %v364_v50 = vadd.f32 0.014752088, %v363_v47  ;;  %v353_v52 = vadd.f32 0.0036580483, %v352_v46 }
 0x1b2   : > { %v365_v53 = vmul.f32 %v364_v50, %v349_v38  ;;  %v354_v57 = vmul.f32 %v353_v52, %v349_v38 }
 0x1b4   : > { %v366_v55 = vadd.f32 0.112945676, %v365_v53  ;;  %v355_v60 = vadd.f32 0.05243302, %v354_v57 }
 0x1b6   : > { %v367_v58 = vmul.f32 %v366_v55, %v349_v38  ;;  %v356_v63 = vmul.f32 %v355_v60, %v349_v38 }
 0x1b8   : > { %v368_v59 = vadd.f32 0.4994258, %v367_v58  ;;  %v357_v1 = vadd.f32 0.18741608, %v356_v63 }
 0x1ba   : > { %v369_v61 = vmul.f32 %v368_v59, %v349_v38  ;;  %v358_v3 = vmul.f32 %v357_v1, %v349_v38 }
 0x1bc   : > { %v370_v62 = vadd.f32 1.0, %v369_v61  ;;  %v359_v7 = vadd.f32 1.1283791, %v358_v3 }
 0x1be   : > { %588 = vrcp.f32 %v370_v62  ;;  %v382_v6 = vand.u32 2147483648, %v370_v62  ;;  %v380_v10 = vand.u32 2147483647, %v370_v62  ;;  %vm376_vm6 = vweird.f32 %v370_v62 }
 0x1bf   : > { %v360_v13 = vmul.f32 %v359_v7, %v347_v36 }
 0x1c0   : > { %v383_v12 = vor.u32 1.1754944e-38, %v382_v6  ;;  %vm381_vm8 = vcmp.eq.f32.partialorder %v380_v10, 8.507059e+37 }
 0x1c4   : > { %v589_v2 = vpop.eup %588 }
 0x1c5   : > { %v372_v4 = vmul.f32 %v589_v2, %v370_v62  ;;  %vm377_vm5 = vweird.f32 %v589_v2 }
 0x1c6   : > { %vm378_vm7 = vmor %vm376_vm6, %vm377_vm5 }
 0x1c7   : > { %v373_v5 = vsub.f32 1.0, %v372_v4 }
 0x1c9   : > { %v374_v9 = vmul.f32 %v589_v2, %v373_v5 }
 0x1cb   : > { %v375_v11 = vadd.f32 %v589_v2, %v374_v9 }
 0x1cd   : > { %v379_v14 = vsel %vm378_vm7, %v589_v2, %v375_v11 }
 0x1ce   : > { %v384_v15 = vsel %vm381_vm8, %v383_v12, %v379_v14 }
 0x1cf   : > { %v385_v16 = vmul.f32 %v384_v15, %v360_v13 }
 0x1d1   : > { %v534_v17 = vclamps-f32 %v385_v16, 1.0 }
 0x1d3   : > { %v388_v19 = vadd.f32 1.0, %v534_v17 }
 0x1d5   : > { %v389_v20 = vmul.f32 %v388_v19, %v346_v18 }
 0x1d7   : > { %535 = vmatmul.msk.f32.vlgmr.msra.gmra.mxu1 %vm402_vm9, %v389_v20 }
 0x254   : > { %v423_v22 = vpop.f32.mrf.mxu1 }
 0x255   : > { %v424_v23 = vadd.f32 %v583_v21, %v423_v22 }
 0x257   : > { %v426_v24 = vadd.f32 %v424_v23, %v750_v0 }
 0x259   : > { %v427_v25 = vsel %vm277_vm0, %v426_v24, 0.0 }
 0x25a   : > { %428 = vadd.xlane.f32.xlu1 %v427_v25 }
 0x2cd   : > { %v429_v26 = vpop.xlane.xlu1 %428 }
 0x2ce   : > { %v430_v28 = vmul.f32 %v429_v26, %v754_v8 }
 0x2d0   : > { %v431_v29 = vsub.f32 %v426_v24, %v430_v28 }
 0x2d2   : > { %v432_v31 = vmul.f32 %v431_v29, %v431_v29 }
 0x2d4   : > { %v433_v32 = vsel %vm277_vm0, %v432_v31, 0.0 }
 0x2d5   : > { %434 = vadd.xlane.f32.xlu1 %v433_v32 }
 0x348   : > { %v435_v33 = vpop.xlane.xlu1 %434 }
 0x349   : > { %v436_v34 = vmul.f32 %v435_v33, %v754_v8 }
 0x34b   : > { %v437_v35 = vadd.f32 1e-05, %v436_v34 }
 0x34d   : > { %590 = vrsqrt.f32 %v437_v35  ;;  %vm444_vm11 = vweird.f32 %v437_v35 }
 0x353   : > { %v591_v36 = vpop.eup %590 }
 0x354   : > { %v439_v0 = vmul.f32 %v591_v36, %v437_v35  ;;  %vm445_vm10 = vweird.f32 %v591_v36 }
 0x355   : > { %vm446_vm12 = vmor %vm444_vm11, %vm445_vm10 }
 0x356   : > { %v440_v37 = vmul.f32 %v591_v36, %v439_v0 }
 0x358   : > { %v441_v38 = vmul.f32 0.5, %v440_v37 }
 0x35a   : > { %v442_v39 = vsub.f32 1.5, %v441_v38 }
 0x35c   : > { %v443_v40 = vmul.f32 %v591_v36, %v442_v39 }
 0x35e   : > { %v447_v8 = vsel %vm446_vm12, %v591_v36, %v443_v40 }
 0x35f   : > { %v448_v41 = vmul.f32 %v447_v8, %v431_v29 }
 0x361   : > { %v449_v42 = vmul.f32 %v775_v27, %v448_v41 }
 0x363   : > { %v450_v43 = vadd.f32 %v780_v30, %v449_v42 }
 0x365   : > { %451 = vst.msk [vmem:[%s269_s14] sm:$0xff] %vm277_vm0, %v450_v43 }
 0x366   : > { %619 = shalt.err (!%p616_p3)
}
 0x367   : > { %540 = dma.vmem_to_hbm [thread:$0]  (%p735_p5), %s466_s15, 128, %s468_s16, %s453_s28  }
 0x368 PF: > { %p546_p4 = scmp.ge.s32.totalorder %s654_s27, 2  ;;  %s479_s22 = sand.u32 1, %s642_s24  }
 0x369   : > { %s480_s8 = scalar_lea.sflag [#allocation3], %s479_s22 }
 0x36a   : > { %p543_p7 = pnand %p546_p4, %p739_p6 }
 0x36c   : > { %p544_p8 = pneg %p543_p7 }
 0x36e   : > { %637 = dma.done.wait (%p544_p8), %s480_s8, 128  }
 0x36f   : > { %639 = vsyncadd (%p544_p8), %s480_s8, 4294967168  ;;  %p17_p9 = scmp.ge.s32.totalorder %s722_s30, 4   ;;  %s865_s24 = smov %s646_s25 }
 0x370   : > { %s866_s25 = smov %s650_s26  ;;  %s867_s26 = smov %s733_s10 }
 0x371   : > { %s868_s27 = smov %s722_s30  ;;  %19 = sbr.rel (!%p17_p9) target bundleno = 3 (0x3), region = 83 }
 0x376   :  { %486 = vsyncpa [#allocation3], 1 }
 0x377   :  { %488 = vsyncpa [#allocation3 + $0x1], 1 }

</bundles_post_ra>
